<compile_context>
chip_gen: v6e
topology: v6e:2x2x1
jax: 0.10.0
libtpu: 0.0.40
codegen_flags: <defaults>
</compile_context>

<pallas_src>
import functools

import jax
import jax.numpy as jnp
from jax.experimental import pallas as pl
from jax.experimental.pallas import tpu as pltpu


def _round_up(x, m):
    return (x + m - 1) // m * m


# -----------------------------------------------------------------------------
# Kernel 1: wide-K conv matmul + bias, plus per-channel sum / sum-of-squares
# accumulation (batch-wide BatchNorm statistics that stay correct under tiling).
# Layout: taps (K, M) with the pixel index M on the lane axis, output (Cout, M).
# -----------------------------------------------------------------------------
def _conv_stats_kernel(taps_ref, w_ref, b_ref, y_ref, sum_ref, sq_ref, *,
                       m_valid, tile_m):
    i = pl.program_id(0)

    @pl.when(i == 0)
    def _init():
        sum_ref[...] = jnp.zeros_like(sum_ref)
        sq_ref[...] = jnp.zeros_like(sq_ref)

    # Single wide-K MXU push: (Cout, K) @ (K, TM) -> (Cout, TM), f32 accumulate.
    acc = jnp.dot(w_ref[...], taps_ref[...], preferred_element_type=jnp.float32)
    acc = acc + b_ref[...]                       # conv bias (broadcast over lanes)
    y_ref[...] = acc

    # BatchNorm statistics: mask lanes beyond the true M (zero-padded tail).
    lane = jax.lax.broadcasted_iota(jnp.int32, acc.shape, 1) + i * tile_m
    accm = jnp.where(lane < m_valid, acc, 0.0)
    sum_ref[...] += jnp.sum(accm, axis=1, keepdims=True)
    sq_ref[...] += jnp.sum(accm * accm, axis=1, keepdims=True)


def _conv_stats(taps, w_flat, bias, m, tile_m):
    """taps (K, m) f32, w_flat (Cout, K) -> (y_pre (Cout, m_pad) f32, sum, sumsq)."""
    K, _ = taps.shape
    Cout = w_flat.shape[0]
    tm = min(tile_m, _round_up(m, 128))
    m_pad = _round_up(m, tm)
    k_pad = _round_up(K, 16)                 # keep bf16 contraction dim aligned

    taps_p = jnp.pad(taps, ((0, k_pad - K), (0, m_pad - m))).astype(jnp.bfloat16)
    w_p = jnp.pad(w_flat, ((0, 0), (0, k_pad - K))).astype(jnp.bfloat16)
    b = bias.reshape(Cout, 1).astype(jnp.float32)

    kernel = functools.partial(_conv_stats_kernel, m_valid=m, tile_m=tm)
    y, ssum, ssq = pl.pallas_call(
        kernel,
        grid=(m_pad // tm,),
        in_specs=[
            pl.BlockSpec((k_pad, tm), lambda i: (0, i)),
            pl.BlockSpec((Cout, k_pad), lambda i: (0, 0)),
            pl.BlockSpec((Cout, 1), lambda i: (0, 0)),
        ],
        out_specs=[
            pl.BlockSpec((Cout, tm), lambda i: (0, i)),
            pl.BlockSpec((Cout, 1), lambda i: (0, 0)),   # resident accumulators
            pl.BlockSpec((Cout, 1), lambda i: (0, 0)),
        ],
        out_shape=[
            jax.ShapeDtypeStruct((Cout, m_pad), jnp.float32),
            jax.ShapeDtypeStruct((Cout, 1), jnp.float32),
            jax.ShapeDtypeStruct((Cout, 1), jnp.float32),
        ],
        compiler_params=pltpu.CompilerParams(
            dimension_semantics=("arbitrary",),    # stats reduce across M tiles
            vmem_limit_bytes=32 * 1024 * 1024),
    )(taps_p, w_p, b)
    return y, ssum, ssq


# -----------------------------------------------------------------------------
# Kernel 2: bn2 affine + skip (fused 1x1 conv, or identity) + ReLU.
# -----------------------------------------------------------------------------
def _bn_conv_skip_relu_kernel(y_ref, scale_ref, shift_ref, xs_ref, w3_ref,
                              b3_ref, o_ref):
    y = y_ref[...] * scale_ref[...] + shift_ref[...]                  # bn2 (f32)
    skip = jnp.dot(w3_ref[...], xs_ref[...],
                   preferred_element_type=jnp.float32) + b3_ref[...]  # 1x1 conv3
    o_ref[...] = jnp.maximum(y + skip, 0.0)


def _bn_identity_skip_relu_kernel(y_ref, scale_ref, shift_ref, skip_ref, o_ref):
    y = y_ref[...] * scale_ref[...] + shift_ref[...]
    o_ref[...] = jnp.maximum(y + skip_ref[...], 0.0)


def _bn_skip_relu(y_pre_pad, scale, shift, skip, m, tile_m, w3_flat=None, b3=None):
    Cout, m_pad = y_pre_pad.shape
    tm = min(tile_m, _round_up(m, 128))
    assert m_pad == _round_up(m, tm)
    grid = (m_pad // tm,)
    cparams = pltpu.CompilerParams(dimension_semantics=("parallel",),
                                   vmem_limit_bytes=32 * 1024 * 1024)
    common_in = [
        pl.BlockSpec((Cout, tm), lambda i: (0, i)),
        pl.BlockSpec((Cout, 1), lambda i: (0, 0)),
        pl.BlockSpec((Cout, 1), lambda i: (0, 0)),
    ]
    out_spec = pl.BlockSpec((Cout, tm), lambda i: (0, i))
    out_shape = jax.ShapeDtypeStruct((Cout, m_pad), jnp.float32)

    if w3_flat is not None:                      # use_1x1conv: fused skip conv
        Cin = skip.shape[0]
        c_pad = _round_up(Cin, 16)
        xs_p = jnp.pad(skip, ((0, c_pad - Cin), (0, m_pad - m))).astype(jnp.bfloat16)
        w3_p = jnp.pad(w3_flat, ((0, 0), (0, c_pad - Cin))).astype(jnp.bfloat16)
        return pl.pallas_call(
            _bn_conv_skip_relu_kernel,
            grid=grid,
            in_specs=common_in + [
                pl.BlockSpec((c_pad, tm), lambda i: (0, i)),
                pl.BlockSpec((Cout, c_pad), lambda i: (0, 0)),
                pl.BlockSpec((Cout, 1), lambda i: (0, 0)),
            ],
            out_specs=out_spec, out_shape=out_shape, compiler_params=cparams,
        )(y_pre_pad, scale, shift, xs_p, w3_p,
          b3.reshape(Cout, 1).astype(jnp.float32))

    skip_p = jnp.pad(skip.astype(jnp.float32), ((0, 0), (0, m_pad - m)))
    return pl.pallas_call(
        _bn_identity_skip_relu_kernel,
        grid=grid,
        in_specs=common_in + [pl.BlockSpec((Cout, tm), lambda i: (0, i))],
        out_specs=out_spec, out_shape=out_shape, compiler_params=cparams,
    )(y_pre_pad, scale, shift, skip_p)


# -----------------------------------------------------------------------------
# Plain-JAX glue: tap slab construction (channels-first, M on the lane axis),
# weight flattening, and BN coefficient finalization from the sums.
# -----------------------------------------------------------------------------
def _extract_taps(x_cnhw, k, stride, pad):
    """x (C, N, H, W) -> taps (k*k*C, N*Ho*Wo); pixel index on the lane axis."""
    C, N, H, W = x_cnhw.shape
    Ho = (H + 2 * pad - k) // stride + 1
    Wo = (W + 2 * pad - k) // stride + 1
    xp = jnp.pad(x_cnhw, ((0, 0), (0, 0), (pad, pad), (pad, pad)))
    taps = []
    for dy in range(k):
        for dx in range(k):
            sl = xp[:, :, dy:dy + stride * (Ho - 1) + 1:stride,
                          dx:dx + stride * (Wo - 1) + 1:stride]
            taps.append(sl.reshape(C, N * Ho * Wo))
    # TODO(synk): the tap slab still duplicates the conv input ~k*k times in HBM;
    # building the shifted taps inside the kernel from the padded input would cut
    # conv-input HBM traffic ~9x.
    return jnp.concatenate(taps, axis=0), (N, Ho, Wo)


def _flatten_weight(w_oihw):
    Cout = w_oihw.shape[0]
    # K index ordering (dy, dx, ci) matches the tap concatenation above.
    return jnp.transpose(w_oihw, (0, 2, 3, 1)).reshape(Cout, -1)


def _bn_coeffs(ssum, ssq, gamma, beta, m, eps):
    mean = ssum / m
    var = jnp.maximum(ssq / m - mean * mean, 0.0)
    scale = gamma.reshape(-1, 1).astype(jnp.float32) * jax.lax.rsqrt(var + eps)
    shift = beta.reshape(-1, 1).astype(jnp.float32) - mean * scale
    return scale, shift


# -----------------------------------------------------------------------------
# Residual.forward
# -----------------------------------------------------------------------------
def residual_forward(x_nchw, params, strides=1, use_1x1conv=False, eps=1e-5,
                     tile_m=512):
    N, Cin, H, W = x_nchw.shape
    Cout = params["w1"].shape[0]
    x = jnp.transpose(x_nchw.astype(jnp.float32), (1, 0, 2, 3))      # (Cin,N,H,W)

    # ---- conv1 (3x3, stride=strides, pad=1) + batch statistics ---------------
    taps1, (n1, h1, w1) = _extract_taps(x, 3, strides, 1)
    m = n1 * h1 * w1
    y1_pre, s1, q1 = _conv_stats(taps1, _flatten_weight(params["w1"]),
                                 params["b1"], m, tile_m)
    scale1, shift1 = _bn_coeffs(s1, q1, params["g1"], params["beta1"], m, eps)

    # ---- bn1 + relu applied element-wise while building the conv2 tap slab ---
    y1 = jnp.maximum(y1_pre[:, :m] * scale1 + shift1, 0.0)            # (Cout, m)
    taps2, _ = _extract_taps(y1.reshape(Cout, n1, h1, w1), 3, 1, 1)

    # ---- conv2 (3x3, stride=1, pad=1) + batch statistics ----------------------
    y2_pre, s2, q2 = _conv_stats(taps2, _flatten_weight(params["w2"]),
                                 params["b2"], m, tile_m)
    scale2, shift2 = _bn_coeffs(s2, q2, params["g2"], params["beta2"], m, eps)

    # ---- bn2 + skip (fused 1x1 conv or identity) + relu -----------------------
    if use_1x1conv:
        xs = x[:, :, ::strides, ::strides].reshape(Cin, m)
        out = _bn_skip_relu(y2_pre, scale2, shift2, xs, m, tile_m,
                            w3_flat=params["w3"].reshape(Cout, Cin),
                            b3=params["b3"])
    else:
        if strides != 1 or Cin != Cout:
            raise ValueError("identity skip requires strides == 1 and "
                             "input_channels == num_channels")
        out = _bn_skip_relu(y2_pre, scale2, shift2, x.reshape(Cin, m), m, tile_m)

    out = out[:, :m].reshape(Cout, n1, h1, w1)
    return jnp.transpose(out, (1, 0, 2, 3))                           # NCHW
    # TODO(synk): BatchNorm2d running_mean/running_var buffer updates (training
    # side effect) are not produced; forward output only.


# -----------------------------------------------------------------------------
# Pure-JAX reference (correctness check only)
# -----------------------------------------------------------------------------
def residual_reference(x, params, strides=1, use_1x1conv=False, eps=1e-5):
    def conv(x, w, b, stride, pad):
        y = jax.lax.conv_general_dilated(
            x, w, (stride, stride), [(pad, pad), (pad, pad)],
            dimension_numbers=("NCHW", "OIHW", "NCHW"),
            precision=jax.lax.Precision.HIGHEST)
        return y + b.reshape(1, -1, 1, 1)

    def bn(x, gamma, beta):
        mean = jnp.mean(x, axis=(0, 2, 3), keepdims=True)
        var = jnp.mean((x - mean) ** 2, axis=(0, 2, 3), keepdims=True)
        xn = (x - mean) * jax.lax.rsqrt(var + eps)
        return xn * gamma.reshape(1, -1, 1, 1) + beta.reshape(1, -1, 1, 1)

    y = jax.nn.relu(bn(conv(x, params["w1"], params["b1"], strides, 1),
                       params["g1"], params["beta1"]))
    y = bn(conv(y, params["w2"], params["b2"], 1, 1),
           params["g2"], params["beta2"])
    sk = conv(x, params["w3"], params["b3"], strides, 0) if use_1x1conv else x
    return jax.nn.relu(y + sk)


if __name__ == "__main__":
    def make_params(key, cin, cout, use_1x1conv):
        ks = jax.random.split(key, 6)
        p = {
            "w1": 0.1 * jax.random.normal(ks[0], (cout, cin, 3, 3), jnp.float32),
            "b1": 0.05 * jax.random.normal(ks[1], (cout,), jnp.float32),
            "w2": 0.1 * jax.random.normal(ks[2], (cout, cout, 3, 3), jnp.float32),
            "b2": 0.05 * jax.random.normal(ks[3], (cout,), jnp.float32),
            # BatchNorm2d default init: weight(gamma)=1, bias(beta)=0
            "g1": jnp.ones((cout,), jnp.float32),
            "beta1": jnp.zeros((cout,), jnp.float32),
            "g2": jnp.ones((cout,), jnp.float32),
            "beta2": jnp.zeros((cout,), jnp.float32),
        }
        if use_1x1conv:
            p["w3"] = 0.1 * jax.random.normal(ks[4], (cout, cin, 1, 1), jnp.float32)
            p["b3"] = 0.05 * jax.random.normal(ks[5], (cout,), jnp.float32)
        return p

    key = jax.random.PRNGKey(0)
    k0, k1, k2, k3 = jax.random.split(key, 4)

    # Case 1: downsampling block (d2l usage): 4 -> 8 channels, stride 2, 1x1 skip.
    N, Cin, Cout, H, W = 2, 4, 8, 16, 16
    x = jax.random.normal(k0, (N, Cin, H, W), jnp.float32)
    params = make_params(k1, Cin, Cout, True)
    fwd = jax.jit(functools.partial(residual_forward, strides=2, use_1x1conv=True))
    out = jax.block_until_ready(fwd(x, params))
    ref = residual_reference(x, params, strides=2, use_1x1conv=True)
    assert out.shape == ref.shape == (N, Cout, H // 2, W // 2)
    assert jnp.allclose(out, ref, atol=3e-2, rtol=3e-2), \
        float(jnp.max(jnp.abs(out - ref)))

    # Case 2: identity-skip block (Cin == Cout, stride 1); small tile_m exercises
    # the multi-tile grid and the cross-tile BatchNorm statistics accumulation.
    C = 8
    x2 = jax.random.normal(k2, (N, C, H, W), jnp.float32)
    params2 = make_params(k3, C, C, False)
    fwd2 = jax.jit(functools.partial(residual_forward, strides=1,
                                     use_1x1conv=False, tile_m=128))
    out2 = jax.block_until_ready(fwd2(x2, params2))
    ref2 = residual_reference(x2, params2, strides=1, use_1x1conv=False)
    assert out2.shape == ref2.shape == (N, C, H, W)
    assert jnp.allclose(out2, ref2, atol=3e-2, rtol=3e-2), \
        float(jnp.max(jnp.abs(out2 - ref2)))

    print("KERNEL_OK")
</pallas_src>

<mosaic_0001>
module attributes {stable_mosaic.version = 11 : i64} {
  func.func @_conv_stats_kernel(%arg0: i32, %arg1: memref<48x128xbf16, #tpu.memory_space<vmem>>, %arg2: memref<8x48xbf16, #tpu.memory_space<vmem>>, %arg3: memref<8x1xf32, #tpu.memory_space<vmem>>, %arg4: memref<8x128xf32, #tpu.memory_space<vmem>>, %arg5: memref<8x1xf32, #tpu.memory_space<vmem>>, %arg6: memref<8x1xf32, #tpu.memory_space<vmem>>) attributes {dimension_semantics = [#tpu.dimension_semantics<arbitrary>], iteration_bounds = array<i64: 1>, scalar_prefetch = 0 : i64, scratch_operands = 0 : i64, tpu.core_type = #tpu.core_type<tc>, window_params = [{transform_indices = @transform_0, window_bounds = array<i64: 48, 128>}, {pipeline_mode = #tpu.pipeline_mode<synchronous>, transform_indices = @transform_1, window_bounds = array<i64: 8, 48>}, {pipeline_mode = #tpu.pipeline_mode<synchronous>, transform_indices = @transform_2, window_bounds = array<i64: 8, 1>}, {transform_indices = @transform_3, window_bounds = array<i64: 8, 128>}, {pipeline_mode = #tpu.pipeline_mode<synchronous>, transform_indices = @transform_4, window_bounds = array<i64: 8, 1>}, {pipeline_mode = #tpu.pipeline_mode<synchronous>, transform_indices = @transform_5, window_bounds = array<i64: 8, 1>}]} {
    %c0_i32 = arith.constant 0 : i32
    %0 = arith.cmpi eq, %arg0, %c0_i32 : i32
    %1 = arith.extui %0 : i1 to i32
    %c0_i32_0 = arith.constant 0 : i32
    %2 = arith.cmpi ne, %1, %c0_i32_0 : i32
    scf.if %2 {
      %cst_20 = arith.constant 0.000000e+00 : f32
      %29 = vector.broadcast %cst_20 : f32 to vector<8x1xf32>
      %c0_21 = arith.constant 0 : index
      %c0_22 = arith.constant 0 : index
      %30 = vector.load %arg5[%c0_21, %c0_22] : memref<8x1xf32, #tpu.memory_space<vmem>>, vector<8x1xf32>
      tpu.vector_store %arg5[%c0_21, %c0_22], %29 {strides = array<i32>} : memref<8x1xf32, #tpu.memory_space<vmem>>, vector<8x1xf32>,
      %cst_23 = arith.constant 0.000000e+00 : f32
      %31 = vector.broadcast %cst_23 : f32 to vector<8x1xf32>
      %c0_24 = arith.constant 0 : index
      %c0_25 = arith.constant 0 : index
      %32 = vector.load %arg6[%c0_24, %c0_25] : memref<8x1xf32, #tpu.memory_space<vmem>>, vector<8x1xf32>
      tpu.vector_store %arg6[%c0_24, %c0_25], %31 {strides = array<i32>} : memref<8x1xf32, #tpu.memory_space<vmem>>, vector<8x1xf32>,
    } else {
    }
    %c0 = arith.constant 0 : index
    %c0_1 = arith.constant 0 : index
    %3 = vector.load %arg2[%c0, %c0_1] : memref<8x48xbf16, #tpu.memory_space<vmem>>, vector<8x48xbf16>
    %c0_2 = arith.constant 0 : index
    %c0_3 = arith.constant 0 : index
    %4 = vector.load %arg1[%c0_2, %c0_3] : memref<48x128xbf16, #tpu.memory_space<vmem>>, vector<48x128xbf16>
    %cst = arith.constant dense<0.000000e+00> : vector<8x128xf32>
    %5 = tpu.matmul %3, %4, %cst {dimension_numbers = #tpu.dot_dimension_numbers<[1], [0], [0], [1], [0, 0, 1, 1], [], []>} : vector<8x48xbf16>, vector<48x128xbf16>, vector<8x128xf32> -> vector<8x128xf32>
    %c0_4 = arith.constant 0 : index
    %c0_5 = arith.constant 0 : index
    %6 = vector.load %arg3[%c0_4, %c0_5] : memref<8x1xf32, #tpu.memory_space<vmem>>, vector<8x1xf32>
    %7 = vector.broadcast %6 : vector<8x1xf32> to vector<8x128xf32>
    %8 = arith.addf %5, %7 : vector<8x128xf32>
    %c0_6 = arith.constant 0 : index
    %c0_7 = arith.constant 0 : index
    %9 = vector.load %arg4[%c0_6, %c0_7] : memref<8x128xf32, #tpu.memory_space<vmem>>, vector<8x128xf32>
    tpu.vector_store %arg4[%c0_6, %c0_7], %8 {strides = array<i32>} : memref<8x128xf32, #tpu.memory_space<vmem>>, vector<8x128xf32>,
    %10 = tpu.iota {dimensions = array<i32: 1>} : vector<8x128xi32>
    %c128_i32 = arith.constant 128 : i32
    %11 = arith.muli %arg0, %c128_i32 : i32
    %12 = vector.broadcast %11 : i32 to vector<8x128xi32>
    %13 = arith.addi %10, %12 : vector<8x128xi32>
    %c128_i32_8 = arith.constant 128 : i32
    %14 = vector.broadcast %c128_i32_8 : i32 to vector<8x128xi32>
    %15 = arith.cmpi slt, %13, %14 : vector<8x128xi32>
    %cst_9 = arith.constant 0.000000e+00 : f32
    %16 = vector.broadcast %cst_9 : f32 to vector<8x128xf32>
    %17 = arith.select %15, %8, %16 : vector<8x128xi1>, vector<8x128xf32>
    %c0_10 = arith.constant 0 : index
    %c0_11 = arith.constant 0 : index
    %18 = vector.load %arg5[%c0_10, %c0_11] : memref<8x1xf32, #tpu.memory_space<vmem>>, vector<8x1xf32>
    %cst_12 = arith.constant dense<0.000000e+00> : vector<8xf32>
    %19 = vector.multi_reduction <add>, %17, %cst_12 [1] : vector<8x128xf32> to vector<8xf32>
    %20 = vector.shape_cast %19 : vector<8xf32> to vector<8x1xf32>
    %21 = arith.addf %18, %20 : vector<8x1xf32>
    %c0_13 = arith.constant 0 : index
    %c0_14 = arith.constant 0 : index
    %22 = vector.load %arg5[%c0_13, %c0_14] : memref<8x1xf32, #tpu.memory_space<vmem>>, vector<8x1xf32>
    tpu.vector_store %arg5[%c0_13, %c0_14], %21 {strides = array<i32>} : memref<8x1xf32, #tpu.memory_space<vmem>>, vector<8x1xf32>,
    %c0_15 = arith.constant 0 : index
    %c0_16 = arith.constant 0 : index
    %23 = vector.load %arg6[%c0_15, %c0_16] : memref<8x1xf32, #tpu.memory_space<vmem>>, vector<8x1xf32>
    %24 = arith.mulf %17, %17 : vector<8x128xf32>
    %cst_17 = arith.constant dense<0.000000e+00> : vector<8xf32>
    %25 = vector.multi_reduction <add>, %24, %cst_17 [1] : vector<8x128xf32> to vector<8xf32>
    %26 = vector.shape_cast %25 : vector<8xf32> to vector<8x1xf32>
    %27 = arith.addf %23, %26 : vector<8x1xf32>
    %c0_18 = arith.constant 0 : index
    %c0_19 = arith.constant 0 : index
    %28 = vector.load %arg6[%c0_18, %c0_19] : memref<8x1xf32, #tpu.memory_space<vmem>>, vector<8x1xf32>
    tpu.vector_store %arg6[%c0_18, %c0_19], %27 {strides = array<i32>} : memref<8x1xf32, #tpu.memory_space<vmem>>, vector<8x1xf32>,
    return
  }
  func.func @transform_0(%arg0: i32) -> (i32, i32) {
    %c0_i32 = arith.constant 0 : i32
    %c0_i32_0 = arith.constant 0 : i32
    return %c0_i32, %arg0 : i32, i32
  }
  func.func @transform_1(%arg0: i32) -> (i32, i32) {
    %c0_i32 = arith.constant 0 : i32
    %c0_i32_0 = arith.constant 0 : i32
    %c0_i32_1 = arith.constant 0 : i32
    return %c0_i32, %c0_i32_0 : i32, i32
  }
  func.func @transform_2(%arg0: i32) -> (i32, i32) {
    %c0_i32 = arith.constant 0 : i32
    %c0_i32_0 = arith.constant 0 : i32
    %c0_i32_1 = arith.constant 0 : i32
    return %c0_i32, %c0_i32_0 : i32, i32
  }
  func.func @transform_3(%arg0: i32) -> (i32, i32) {
    %c0_i32 = arith.constant 0 : i32
    %c0_i32_0 = arith.constant 0 : i32
    return %c0_i32, %arg0 : i32, i32
  }
  func.func @transform_4(%arg0: i32) -> (i32, i32) {
    %c0_i32 = arith.constant 0 : i32
    %c0_i32_0 = arith.constant 0 : i32
    %c0_i32_1 = arith.constant 0 : i32
    return %c0_i32, %c0_i32_0 : i32, i32
  }
  func.func @transform_5(%arg0: i32) -> (i32, i32) {
    %c0_i32 = arith.constant 0 : i32
    %c0_i32_0 = arith.constant 0 : i32
    %c0_i32_1 = arith.constant 0 : i32
    return %c0_i32, %c0_i32_0 : i32, i32
  }
}

module attributes {stable_mosaic.version = 11 : i64} {
  func.func @_conv_stats_kernel(%arg0: i32, %arg1: memref<80x128xbf16, #tpu.memory_space<vmem>>, %arg2: memref<8x80xbf16, #tpu.memory_space<vmem>>, %arg3: memref<8x1xf32, #tpu.memory_space<vmem>>, %arg4: memref<8x128xf32, #tpu.memory_space<vmem>>, %arg5: memref<8x1xf32, #tpu.memory_space<vmem>>, %arg6: memref<8x1xf32, #tpu.memory_space<vmem>>) attributes {dimension_semantics = [#tpu.dimension_semantics<arbitrary>], iteration_bounds = array<i64: 1>, scalar_prefetch = 0 : i64, scratch_operands = 0 : i64, tpu.core_type = #tpu.core_type<tc>, window_params = [{transform_indices = @transform_0, window_bounds = array<i64: 80, 128>}, {pipeline_mode = #tpu.pipeline_mode<synchronous>, transform_indices = @transform_1, window_bounds = array<i64: 8, 80>}, {pipeline_mode = #tpu.pipeline_mode<synchronous>, transform_indices = @transform_2, window_bounds = array<i64: 8, 1>}, {transform_indices = @transform_3, window_bounds = array<i64: 8, 128>}, {pipeline_mode = #tpu.pipeline_mode<synchronous>, transform_indices = @transform_4, window_bounds = array<i64: 8, 1>}, {pipeline_mode = #tpu.pipeline_mode<synchronous>, transform_indices = @transform_5, window_bounds = array<i64: 8, 1>}]} {
    %c0_i32 = arith.constant 0 : i32
    %0 = arith.cmpi eq, %arg0, %c0_i32 : i32
    %1 = arith.extui %0 : i1 to i32
    %c0_i32_0 = arith.constant 0 : i32
    %2 = arith.cmpi ne, %1, %c0_i32_0 : i32
    scf.if %2 {
      %cst_20 = arith.constant 0.000000e+00 : f32
      %29 = vector.broadcast %cst_20 : f32 to vector<8x1xf32>
      %c0_21 = arith.constant 0 : index
      %c0_22 = arith.constant 0 : index
      %30 = vector.load %arg5[%c0_21, %c0_22] : memref<8x1xf32, #tpu.memory_space<vmem>>, vector<8x1xf32>
      tpu.vector_store %arg5[%c0_21, %c0_22], %29 {strides = array<i32>} : memref<8x1xf32, #tpu.memory_space<vmem>>, vector<8x1xf32>,
      %cst_23 = arith.constant 0.000000e+00 : f32
      %31 = vector.broadcast %cst_23 : f32 to vector<8x1xf32>
      %c0_24 = arith.constant 0 : index
      %c0_25 = arith.constant 0 : index
      %32 = vector.load %arg6[%c0_24, %c0_25] : memref<8x1xf32, #tpu.memory_space<vmem>>, vector<8x1xf32>
      tpu.vector_store %arg6[%c0_24, %c0_25], %31 {strides = array<i32>} : memref<8x1xf32, #tpu.memory_space<vmem>>, vector<8x1xf32>,
    } else {
    }
    %c0 = arith.constant 0 : index
    %c0_1 = arith.constant 0 : index
    %3 = vector.load %arg2[%c0, %c0_1] : memref<8x80xbf16, #tpu.memory_space<vmem>>, vector<8x80xbf16>
    %c0_2 = arith.constant 0 : index
    %c0_3 = arith.constant 0 : index
    %4 = vector.load %arg1[%c0_2, %c0_3] : memref<80x128xbf16, #tpu.memory_space<vmem>>, vector<80x128xbf16>
    %cst = arith.constant dense<0.000000e+00> : vector<8x128xf32>
    %5 = tpu.matmul %3, %4, %cst {dimension_numbers = #tpu.dot_dimension_numbers<[1], [0], [0], [1], [0, 0, 1, 1], [], []>} : vector<8x80xbf16>, vector<80x128xbf16>, vector<8x128xf32> -> vector<8x128xf32>
    %c0_4 = arith.constant 0 : index
    %c0_5 = arith.constant 0 : index
    %6 = vector.load %arg3[%c0_4, %c0_5] : memref<8x1xf32, #tpu.memory_space<vmem>>, vector<8x1xf32>
    %7 = vector.broadcast %6 : vector<8x1xf32> to vector<8x128xf32>
    %8 = arith.addf %5, %7 : vector<8x128xf32>
    %c0_6 = arith.constant 0 : index
    %c0_7 = arith.constant 0 : index
    %9 = vector.load %arg4[%c0_6, %c0_7] : memref<8x128xf32, #tpu.memory_space<vmem>>, vector<8x128xf32>
    tpu.vector_store %arg4[%c0_6, %c0_7], %8 {strides = array<i32>} : memref<8x128xf32, #tpu.memory_space<vmem>>, vector<8x128xf32>,
    %10 = tpu.iota {dimensions = array<i32: 1>} : vector<8x128xi32>
    %c128_i32 = arith.constant 128 : i32
    %11 = arith.muli %arg0, %c128_i32 : i32
    %12 = vector.broadcast %11 : i32 to vector<8x128xi32>
    %13 = arith.addi %10, %12 : vector<8x128xi32>
    %c128_i32_8 = arith.constant 128 : i32
    %14 = vector.broadcast %c128_i32_8 : i32 to vector<8x128xi32>
    %15 = arith.cmpi slt, %13, %14 : vector<8x128xi32>
    %cst_9 = arith.constant 0.000000e+00 : f32
    %16 = vector.broadcast %cst_9 : f32 to vector<8x128xf32>
    %17 = arith.select %15, %8, %16 : vector<8x128xi1>, vector<8x128xf32>
    %c0_10 = arith.constant 0 : index
    %c0_11 = arith.constant 0 : index
    %18 = vector.load %arg5[%c0_10, %c0_11] : memref<8x1xf32, #tpu.memory_space<vmem>>, vector<8x1xf32>
    %cst_12 = arith.constant dense<0.000000e+00> : vector<8xf32>
    %19 = vector.multi_reduction <add>, %17, %cst_12 [1] : vector<8x128xf32> to vector<8xf32>
    %20 = vector.shape_cast %19 : vector<8xf32> to vector<8x1xf32>
    %21 = arith.addf %18, %20 : vector<8x1xf32>
    %c0_13 = arith.constant 0 : index
    %c0_14 = arith.constant 0 : index
    %22 = vector.load %arg5[%c0_13, %c0_14] : memref<8x1xf32, #tpu.memory_space<vmem>>, vector<8x1xf32>
    tpu.vector_store %arg5[%c0_13, %c0_14], %21 {strides = array<i32>} : memref<8x1xf32, #tpu.memory_space<vmem>>, vector<8x1xf32>,
    %c0_15 = arith.constant 0 : index
    %c0_16 = arith.constant 0 : index
    %23 = vector.load %arg6[%c0_15, %c0_16] : memref<8x1xf32, #tpu.memory_space<vmem>>, vector<8x1xf32>
    %24 = arith.mulf %17, %17 : vector<8x128xf32>
    %cst_17 = arith.constant dense<0.000000e+00> : vector<8xf32>
    %25 = vector.multi_reduction <add>, %24, %cst_17 [1] : vector<8x128xf32> to vector<8xf32>
    %26 = vector.shape_cast %25 : vector<8xf32> to vector<8x1xf32>
    %27 = arith.addf %23, %26 : vector<8x1xf32>
    %c0_18 = arith.constant 0 : index
    %c0_19 = arith.constant 0 : index
    %28 = vector.load %arg6[%c0_18, %c0_19] : memref<8x1xf32, #tpu.memory_space<vmem>>, vector<8x1xf32>
    tpu.vector_store %arg6[%c0_18, %c0_19], %27 {strides = array<i32>} : memref<8x1xf32, #tpu.memory_space<vmem>>, vector<8x1xf32>,
    return
  }
  func.func @transform_0(%arg0: i32) -> (i32, i32) {
    %c0_i32 = arith.constant 0 : i32
    %c0_i32_0 = arith.constant 0 : i32
    return %c0_i32, %arg0 : i32, i32
  }
  func.func @transform_1(%arg0: i32) -> (i32, i32) {
    %c0_i32 = arith.constant 0 : i32
    %c0_i32_0 = arith.constant 0 : i32
    %c0_i32_1 = arith.constant 0 : i32
    return %c0_i32, %c0_i32_0 : i32, i32
  }
  func.func @transform_2(%arg0: i32) -> (i32, i32) {
    %c0_i32 = arith.constant 0 : i32
    %c0_i32_0 = arith.constant 0 : i32
    %c0_i32_1 = arith.constant 0 : i32
    return %c0_i32, %c0_i32_0 : i32, i32
  }
  func.func @transform_3(%arg0: i32) -> (i32, i32) {
    %c0_i32 = arith.constant 0 : i32
    %c0_i32_0 = arith.constant 0 : i32
    return %c0_i32, %arg0 : i32, i32
  }
  func.func @transform_4(%arg0: i32) -> (i32, i32) {
    %c0_i32 = arith.constant 0 : i32
    %c0_i32_0 = arith.constant 0 : i32
    %c0_i32_1 = arith.constant 0 : i32
    return %c0_i32, %c0_i32_0 : i32, i32
  }
  func.func @transform_5(%arg0: i32) -> (i32, i32) {
    %c0_i32 = arith.constant 0 : i32
    %c0_i32_0 = arith.constant 0 : i32
    %c0_i32_1 = arith.constant 0 : i32
    return %c0_i32, %c0_i32_0 : i32, i32
  }
}

module attributes {stable_mosaic.version = 11 : i64} {
  func.func @_bn_conv_skip_relu_kernel(%arg0: i32, %arg1: memref<8x128xf32, #tpu.memory_space<vmem>>, %arg2: memref<8x1xf32, #tpu.memory_space<vmem>>, %arg3: memref<8x1xf32, #tpu.memory_space<vmem>>, %arg4: memref<16x128xbf16, #tpu.memory_space<vmem>>, %arg5: memref<8x16xbf16, #tpu.memory_space<vmem>>, %arg6: memref<8x1xf32, #tpu.memory_space<vmem>>, %arg7: memref<8x128xf32, #tpu.memory_space<vmem>>) attributes {dimension_semantics = [#tpu.dimension_semantics<parallel>], iteration_bounds = array<i64: 1>, scalar_prefetch = 0 : i64, scratch_operands = 0 : i64, tpu.core_type = #tpu.core_type<tc>, window_params = [{transform_indices = @transform_0, window_bounds = array<i64: 8, 128>}, {pipeline_mode = #tpu.pipeline_mode<synchronous>, transform_indices = @transform_1, window_bounds = array<i64: 8, 1>}, {pipeline_mode = #tpu.pipeline_mode<synchronous>, transform_indices = @transform_2, window_bounds = array<i64: 8, 1>}, {transform_indices = @transform_3, window_bounds = array<i64: 16, 128>}, {pipeline_mode = #tpu.pipeline_mode<synchronous>, transform_indices = @transform_4, window_bounds = array<i64: 8, 16>}, {pipeline_mode = #tpu.pipeline_mode<synchronous>, transform_indices = @transform_5, window_bounds = array<i64: 8, 1>}, {transform_indices = @transform_6, window_bounds = array<i64: 8, 128>}]} {
    %c0 = arith.constant 0 : index
    %c0_0 = arith.constant 0 : index
    %0 = vector.load %arg1[%c0, %c0_0] : memref<8x128xf32, #tpu.memory_space<vmem>>, vector<8x128xf32>
    %c0_1 = arith.constant 0 : index
    %c0_2 = arith.constant 0 : index
    %1 = vector.load %arg2[%c0_1, %c0_2] : memref<8x1xf32, #tpu.memory_space<vmem>>, vector<8x1xf32>
    %2 = vector.broadcast %1 : vector<8x1xf32> to vector<8x128xf32>
    %3 = arith.mulf %0, %2 : vector<8x128xf32>
    %c0_3 = arith.constant 0 : index
    %c0_4 = arith.constant 0 : index
    %4 = vector.load %arg3[%c0_3, %c0_4] : memref<8x1xf32, #tpu.memory_space<vmem>>, vector<8x1xf32>
    %5 = vector.broadcast %4 : vector<8x1xf32> to vector<8x128xf32>
    %6 = arith.addf %3, %5 : vector<8x128xf32>
    %c0_5 = arith.constant 0 : index
    %c0_6 = arith.constant 0 : index
    %7 = vector.load %arg5[%c0_5, %c0_6] : memref<8x16xbf16, #tpu.memory_space<vmem>>, vector<8x16xbf16>
    %c0_7 = arith.constant 0 : index
    %c0_8 = arith.constant 0 : index
    %8 = vector.load %arg4[%c0_7, %c0_8] : memref<16x128xbf16, #tpu.memory_space<vmem>>, vector<16x128xbf16>
    %cst = arith.constant dense<0.000000e+00> : vector<8x128xf32>
    %9 = tpu.matmul %7, %8, %cst {dimension_numbers = #tpu.dot_dimension_numbers<[1], [0], [0], [1], [0, 0, 1, 1], [], []>} : vector<8x16xbf16>, vector<16x128xbf16>, vector<8x128xf32> -> vector<8x128xf32>
    %c0_9 = arith.constant 0 : index
    %c0_10 = arith.constant 0 : index
    %10 = vector.load %arg6[%c0_9, %c0_10] : memref<8x1xf32, #tpu.memory_space<vmem>>, vector<8x1xf32>
    %11 = vector.broadcast %10 : vector<8x1xf32> to vector<8x128xf32>
    %12 = arith.addf %9, %11 : vector<8x128xf32>
    %13 = arith.addf %6, %12 : vector<8x128xf32>
    %cst_11 = arith.constant 0.000000e+00 : f32
    %14 = vector.broadcast %cst_11 : f32 to vector<8x128xf32>
    %15 = arith.maximumf %13, %14 : vector<8x128xf32>
    %c0_12 = arith.constant 0 : index
    %c0_13 = arith.constant 0 : index
    %16 = vector.load %arg7[%c0_12, %c0_13] : memref<8x128xf32, #tpu.memory_space<vmem>>, vector<8x128xf32>
    tpu.vector_store %arg7[%c0_12, %c0_13], %15 {strides = array<i32>} : memref<8x128xf32, #tpu.memory_space<vmem>>, vector<8x128xf32>,
    return
  }
  func.func @transform_0(%arg0: i32) -> (i32, i32) {
    %c0_i32 = arith.constant 0 : i32
    %c0_i32_0 = arith.constant 0 : i32
    return %c0_i32, %arg0 : i32, i32
  }
  func.func @transform_1(%arg0: i32) -> (i32, i32) {
    %c0_i32 = arith.constant 0 : i32
    %c0_i32_0 = arith.constant 0 : i32
    %c0_i32_1 = arith.constant 0 : i32
    return %c0_i32, %c0_i32_0 : i32, i32
  }
  func.func @transform_2(%arg0: i32) -> (i32, i32) {
    %c0_i32 = arith.constant 0 : i32
    %c0_i32_0 = arith.constant 0 : i32
    %c0_i32_1 = arith.constant 0 : i32
    return %c0_i32, %c0_i32_0 : i32, i32
  }
  func.func @transform_3(%arg0: i32) -> (i32, i32) {
    %c0_i32 = arith.constant 0 : i32
    %c0_i32_0 = arith.constant 0 : i32
    return %c0_i32, %arg0 : i32, i32
  }
  func.func @transform_4(%arg0: i32) -> (i32, i32) {
    %c0_i32 = arith.constant 0 : i32
    %c0_i32_0 = arith.constant 0 : i32
    %c0_i32_1 = arith.constant 0 : i32
    return %c0_i32, %c0_i32_0 : i32, i32
  }
  func.func @transform_5(%arg0: i32) -> (i32, i32) {
    %c0_i32 = arith.constant 0 : i32
    %c0_i32_0 = arith.constant 0 : i32
    %c0_i32_1 = arith.constant 0 : i32
    return %c0_i32, %c0_i32_0 : i32, i32
  }
  func.func @transform_6(%arg0: i32) -> (i32, i32) {
    %c0_i32 = arith.constant 0 : i32
    %c0_i32_0 = arith.constant 0 : i32
    return %c0_i32, %arg0 : i32, i32
  }
}

</mosaic_0001>

<bundles_post_ra>
// kernel: residual_forward.3
= control target key start
LH: loop header
LB: loop body
LE: loop exit
PB: predicated region body
PF: predicated region fallthrough
CT: control target
= control target key end

     0   :  { %v157_v0 = vmov 0.0   ;;  %vm158_vm0 = vmmov 0   ;;  %v159_v2 = vmov 0   ;;  %vm56_vm1 = vcmask 392192   ;;  %s230_s0 = inlined_call_operand.vmem [shape: bf16[48,128], index: 0, kind: input, shape index: {}]   ;;  %s231_s2 = inlined_call_operand.vmem [shape: f32[8,1], index: 2, kind: input, shape index: {}]   ;;  %s232_s1 = inlined_call_operand.vmem [shape: bf16[8,48], index: 1, kind: input, shape index: {}]   ;;  %s233_s4 = inlined_call_operand.vmem [shape: f32[8,1], index: 4, kind: output, shape index: {1}]   ;;  %s234_s3 = inlined_call_operand.vmem [shape: f32[8,128], index: 3, kind: output, shape index: {0}]   ;;  %s235_s5 = inlined_call_operand.vmem [shape: f32[8,1], index: 5, kind: output, shape index: {2}]  }
   0x1   :  { %140 = vmatprep.subr.bf16.mxu0 %v157_v0  ;;  %v154_v1 = vld [vmem:[%s230_s0 + $0x10] sm:$0xff]   ;;  %146 = vmatprep.mubr.msk.bf16.mxu0 %vm158_vm0, %v157_v0  ;;  %v155_v3 = vld [vmem:[%s230_s0 + $0x8] sm:$0xff]   ;;  %v32_v4 = vld [vmem:[%s231_s2] sm:$0xff]  ;;  %vm22_vm2 = vcmask 7168  }
   0x2   :  { %153 = vset.pattern.permute.xlu0 %v159_v2  ;;  %141 = vmatpush3.bf16.msra.mxu0 %v154_v1  ;;  %v156_v5 = vld [vmem:[%s230_s0] sm:$0xff]   ;;  %23 = vst.msk [vmem:[%s233_s4] sm:$0xff] %vm22_vm2, %v157_v0  ;;  %24 = vst.msk [vmem:[%s235_s5] sm:$0xff] %vm22_vm2, %v157_v0 }
   0x3   :  { %142 = vmatprep.subr.bf16.mxu0 %v157_v0  ;;  %35 = vperm.xlu0 %153, %v32_v4   ;;  %v25_v6 = vld [vmem:[%s232_s1] sm:$0xf] }
   0x6   :  { %143 = vmatpush3.bf16.msra.mxu0 %v155_v3 }
   0x7   :  { %144 = vmatprep.subr.bf16.mxu0 %v157_v0 }
   0x9   :  { %v108_v14 = vld [vmem:[%s233_s4] sm:$0xff] }
   0xa   :  { %145 = vmatpush3.bf16.msra.mxu0 %v156_v5  ;;  %v114_v16 = vld [vmem:[%s235_s5] sm:$0xff] }
   0xd   :  { %147 = vmatmul.mubr.msk.bf16.vlgmr.msra.gmra.mxu0 %vm56_vm1, %v25_v6 }
  0x7e   :  { %v36_v7 = vpop.permute.xlu0 %35 }
  0xcd   :  { %v94_v8 = vpop.f32.mrf.mxu0 }
  0xce   :  { %v95_v9 = vadd.f32 %v94_v8, %v36_v7 }
  0xcf   :  { %v148_v10 = vpop.f32.mrf.mxu0 }
  0xd0   :  { %100 = vst [vmem:[%s234_s3] sm:$0xff] %v95_v9  ;;  %109 = vadd.xlane.f32.xlu0 %v95_v9  ;;  %v115_v11 = vmul.f32 %v95_v9, %v95_v9 }
  0xd1   :  { %v97_v12 = vpop.f32.mrf.mxu0 }
  0xd2   :  { %116 = vadd.xlane.f32.xlu1 %v115_v11 }
  0xd3   :  { %v149_v13 = vpop.f32.mrf.mxu0 }
 0x159   :  { %v110_v15 = vpop.xlane.xlu0 %109 }
 0x15a   :  { %v111_v17 = vadd.f32 %v110_v15, %v108_v14 }
 0x15b   :  { %v117_v18 = vpop.xlane.xlu1 %116 }
 0x15c   :  { %113 = vst.msk [vmem:[%s233_s4] sm:$0xff] %vm22_vm2, %v111_v17  ;;  %v118_v19 = vadd.f32 %v117_v18, %v114_v16 }
 0x15e   :  { %119 = vst.msk [vmem:[%s235_s5] sm:$0xff] %vm22_vm2, %v118_v19 }

// kernel: residual_forward.4
= control target key start
LH: loop header
LB: loop body
LE: loop exit
PB: predicated region body
PF: predicated region fallthrough
CT: control target
= control target key end

     0   :  { %v183_v0 = vmov 0.0   ;;  %vm184_vm0 = vmmov 0   ;;  %v185_v2 = vmov 0   ;;  %vm72_vm1 = vcmask 654336   ;;  %s262_s0 = inlined_call_operand.vmem [shape: bf16[80,128], index: 0, kind: input, shape index: {}]   ;;  %s263_s2 = inlined_call_operand.vmem [shape: f32[8,1], index: 2, kind: input, shape index: {}]   ;;  %s264_s1 = inlined_call_operand.vmem [shape: bf16[8,80], index: 1, kind: input, shape index: {}]   ;;  %s265_s4 = inlined_call_operand.vmem [shape: f32[8,1], index: 4, kind: output, shape index: {1}]   ;;  %s266_s3 = inlined_call_operand.vmem [shape: f32[8,128], index: 3, kind: output, shape index: {0}]   ;;  %s267_s5 = inlined_call_operand.vmem [shape: f32[8,1], index: 5, kind: output, shape index: {2}]  }
   0x1   :  { %160 = vmatprep.subr.bf16.mxu0 %v183_v0  ;;  %v178_v1 = vld [vmem:[%s262_s0 + $0x20] sm:$0xff]   ;;  %170 = vmatprep.mubr.msk.bf16.mxu0 %vm184_vm0, %v183_v0  ;;  %v179_v3 = vld [vmem:[%s262_s0 + $0x18] sm:$0xff]   ;;  %v180_v5 = vld [vmem:[%s262_s0 + $0x10] sm:$0xff]   ;;  %vm22_vm2 = vcmask 7168  }
   0x2   :  { %177 = vset.pattern.permute.xlu0 %v185_v2  ;;  %161 = vmatpush3.bf16.msra.mxu0 %v178_v1  ;;  %v36_v4 = vld [vmem:[%s263_s2] sm:$0xff]  ;;  %v181_v6 = vld [vmem:[%s262_s0 + $0x8] sm:$0xff]   ;;  %23 = vst.msk [vmem:[%s265_s4] sm:$0xff] %vm22_vm2, %v183_v0  ;;  %24 = vst.msk [vmem:[%s267_s5] sm:$0xff] %vm22_vm2, %v183_v0 }
   0x3   :  { %162 = vmatprep.subr.bf16.mxu0 %v183_v0  ;;  %39 = vperm.xlu0 %177, %v36_v4   ;;  %v182_v7 = vld [vmem:[%s262_s0] sm:$0xff]  }
   0x4   :  { %v25_v8 = vld [vmem:[%s264_s1] sm:$0xf] }
   0x6   :  { %163 = vmatpush3.bf16.msra.mxu0 %v179_v3 }
   0x7   :  { %164 = vmatprep.subr.bf16.mxu0 %v183_v0 }
   0x9   :  { %v124_v16 = vld [vmem:[%s265_s4] sm:$0xff] }
   0xa   :  { %165 = vmatpush3.bf16.msra.mxu0 %v180_v5  ;;  %v130_v18 = vld [vmem:[%s267_s5] sm:$0xff] }
   0xb   :  { %166 = vmatprep.subr.bf16.mxu0 %v183_v0 }
   0xe   :  { %167 = vmatpush3.bf16.msra.mxu0 %v181_v6 }
   0xf   :  { %168 = vmatprep.subr.bf16.mxu0 %v183_v0 }
  0x12   :  { %169 = vmatpush3.bf16.msra.mxu0 %v182_v7 }
  0x15   :  { %171 = vmatmul.mubr.msk.bf16.vlgmr.msra.gmra.mxu0 %vm72_vm1, %v25_v8 }
  0x7e   :  { %v40_v9 = vpop.permute.xlu0 %39 }
  0xd5   :  { %v110_v10 = vpop.f32.mrf.mxu0 }
  0xd6   :  { %v111_v11 = vadd.f32 %v110_v10, %v40_v9 }
  0xd7   :  { %v172_v12 = vpop.f32.mrf.mxu0 }
  0xd8   :  { %116 = vst [vmem:[%s266_s3] sm:$0xff] %v111_v11  ;;  %125 = vadd.xlane.f32.xlu0 %v111_v11  ;;  %v131_v13 = vmul.f32 %v111_v11, %v111_v11 }
  0xd9   :  { %v113_v14 = vpop.f32.mrf.mxu0 }
  0xda   :  { %132 = vadd.xlane.f32.xlu1 %v131_v13 }
  0xdb   :  { %v173_v15 = vpop.f32.mrf.mxu0 }
 0x161   :  { %v126_v17 = vpop.xlane.xlu0 %125 }
 0x162   :  { %v127_v19 = vadd.f32 %v126_v17, %v124_v16 }
 0x163   :  { %v133_v20 = vpop.xlane.xlu1 %132 }
 0x164   :  { %129 = vst.msk [vmem:[%s265_s4] sm:$0xff] %vm22_vm2, %v127_v19  ;;  %v134_v21 = vadd.f32 %v133_v20, %v130_v18 }
 0x166   :  { %135 = vst.msk [vmem:[%s267_s5] sm:$0xff] %vm22_vm2, %v134_v21 }

// kernel: residual_forward.5
= control target key start
LH: loop header
LB: loop body
LE: loop exit
PB: predicated region body
PF: predicated region fallthrough
CT: control target
= control target key end

     0   :  { %v121_v0 = vmov 0.0   ;;  %vm122_vm0 = vmmov 0   ;;  %v123_v2 = vmov 0   ;;  %vm54_vm1 = vcmask 130048   ;;  %s180_s3 = inlined_call_operand.vmem [shape: bf16[16,128], index: 3, kind: input, shape index: {}]   ;;  %s181_s4 = inlined_call_operand.vmem [shape: bf16[8,16], index: 4, kind: input, shape index: {}]   ;;  %s182_s1 = inlined_call_operand.vmem [shape: f32[8,1], index: 1, kind: input, shape index: {}]   ;;  %s183_s5 = inlined_call_operand.vmem [shape: f32[8,1], index: 5, kind: input, shape index: {}]   ;;  %s184_s2 = inlined_call_operand.vmem [shape: f32[8,1], index: 2, kind: input, shape index: {}]   ;;  %s185_s0 = inlined_call_operand.vmem [shape: f32[8,128], index: 0, kind: input, shape index: {}]   ;;  %s186_s6 = inlined_call_operand.vmem [shape: f32[8,128], index: 6, kind: output, shape index: {}]  }
   0x1   :  { %109 = vmatprep.subr.bf16.mxu0 %v121_v0  ;;  %v120_v1 = vld [vmem:[%s180_s3] sm:$0xff]   ;;  %111 = vmatprep.mubr.msk.bf16.mxu0 %vm122_vm0, %v121_v0 }
   0x2   :  { %118 = vset.pattern.permute.xlu0 %v123_v2  ;;  %v25_v3 = vld [vmem:[%s182_s1] sm:$0xff]  ;;  %119 = vset.pattern.permute.xlu1 %v123_v2 }
   0x3   :  { %110 = vmatpush3.bf16.msra.mxu0 %v120_v1  ;;  %v39_v4 = vld [vmem:[%s181_s4] sm:$0xf]  ;;  %28 = vperm.xlu0 %118, %v25_v3  }
   0x4   :  { %v42_v5 = vld [vmem:[%s183_s5] sm:$0xff] }
   0x5   :  { %v32_v6 = vld [vmem:[%s184_s2] sm:$0xff]  ;;  %45 = vperm.xlu1 %119, %v42_v5  }
   0x6   :  { %112 = vmatmul.mubr.msk.bf16.vlgmr.msra.gmra.mxu0 %vm54_vm1, %v39_v4  ;;  %v24_v8 = vld [vmem:[%s185_s0] sm:$0xff] }
   0x7   :  { %35 = vperm.xlu0 %118, %v32_v6  }
  0x7e   :  { %v29_v7 = vpop.permute.xlu0 %28 }
  0x7f   :  { %v31_v9 = vmul.f32 %v29_v7, %v24_v8 }
  0x80   :  { %v46_v11 = vpop.permute.xlu1 %45 }
  0x82   :  { %v36_v10 = vpop.permute.xlu0 %35 }
  0x83   :  { %v38_v13 = vadd.f32 %v36_v10, %v31_v9 }
  0xc6   :  { %v92_v12 = vpop.f32.mrf.mxu0 }
  0xc7   :  { %v93_v14 = vadd.f32 %v92_v12, %v46_v11 }
  0xc8   :  { %v113_v15 = vpop.f32.mrf.mxu0 }
  0xc9   :  { %v98_v16 = vadd.f32 %v93_v14, %v38_v13 }
  0xca   :  { %v95_v17 = vpop.f32.mrf.mxu0 }
  0xcb   :  { %v99_v18 = vmax.f32 %v98_v16, 0.0 }
  0xcc   :  { %v114_v19 = vpop.f32.mrf.mxu0 }
  0xcd   :  { %100 = vst [vmem:[%s186_s6] sm:$0xff] %v99_v18 }

</bundles_post_ra>
